<compile_context>
chip_gen: v7x
topology: tpu7x:2x2x1
jax: 0.10.0
libtpu: 0.0.40
codegen_flags: <defaults>
</compile_context>

<pallas_src>
import jax
import jax.numpy as jnp
import numpy as np
from jax.experimental import pallas as pl
from jax.experimental.pallas import tpu as pltpu


def qnetwork_kernel(s_ref, a_ref,
                    w1s_ref, w1a_ref, b1_ref,
                    w2_ref, b2_ref,
                    w3_ref, b3_ref,
                    o_ref):
    # Layer 1: split matmul over the concat axis (no materialized concat),
    # MXU with f32 accumulation, bias broadcast + ReLU on the VPU.
    h1 = (jnp.dot(s_ref[...], w1s_ref[...], preferred_element_type=jnp.float32)
          + jnp.dot(a_ref[...], w1a_ref[...], preferred_element_type=jnp.float32)
          + b1_ref[...])
    h1 = jnp.maximum(h1, 0.0)

    # Layer 2: Linear + ReLU.
    h2 = jnp.dot(h1, w2_ref[...], preferred_element_type=jnp.float32) + b2_ref[...]
    h2 = jnp.maximum(h2, 0.0)

    # Layer 3 (H -> 1), lane-dense: (1,H) x (tm,H)^T -> (1, tm).  Contracting
    # the last dims of both operands is the standard q@k.T MXU pattern; it puts
    # the batch index on the lane axis so the store is unmasked/lane-dense.
    # MXU is ~idle here anyway (bandwidth/overhead-bound kernel), so the
    # degenerate M=1 matmul costs nothing.
    q_row = jnp.einsum('oh,bh->ob', w3_ref[...], h2,
                       preferred_element_type=jnp.float32)
    o_ref[...] = q_row + b3_ref[...]


def _choose_batch_tile(B, tile_m):
    """Pick (tm, grid). Large lane-aligned tiles; >=2 steps when splitting
    (so the 'parallel' batch axis can use both v7x TensorCores)."""
    if B <= 512:
        return B, 1                       # single full-extent block
    tm = min(tile_m, pl.cdiv(B, 2))       # at least 2 grid steps
    tm = pl.cdiv(tm, 128) * 128           # lane/sublane aligned tile
    return tm, pl.cdiv(B, tm)


def qnetwork_forward(state, action, params, *, tile_m=4096):
    """Pallas-backed forward of QNetwork. state: (B,S), action: (B,A) -> (B,1)."""
    w1, b1, w2, b2, w3, b3 = params
    state = state.astype(jnp.float32)
    action = action.astype(jnp.float32)

    B, S = state.shape
    A = action.shape[-1]

    # Split W1 row-blocks at trace time (replaces the input concat).
    w1s = w1[:S]          # (S, H)
    w1a = w1[S:]          # (A, H)
    w3_row = w3.T         # (1, H)

    tm, grid_m = _choose_batch_tile(B, tile_m)
    out_cols = grid_m * tm                # lane-dense output row width

    batch_spec = lambda feat: pl.BlockSpec((tm, feat), lambda i: (i, 0))
    resident = lambda shape: pl.BlockSpec(shape, lambda i: (0, 0))

    out = pl.pallas_call(
        qnetwork_kernel,
        out_shape=jax.ShapeDtypeStruct((1, out_cols), jnp.float32),
        grid=(grid_m,),
        in_specs=[
            batch_spec(S),          # state tile, streamed over batch (ragged tail OK)
            batch_spec(A),          # action tile, streamed over batch
            resident(w1s.shape),    # weights/biases stay VMEM-resident
            resident(w1a.shape),
            resident(b1.shape),
            resident(w2.shape),
            resident(b2.shape),
            resident(w3_row.shape),
            resident(b3.shape),
        ],
        out_specs=pl.BlockSpec((1, tm), lambda i: (0, i)),   # lane-dense output slab
        compiler_params=pltpu.CompilerParams(
            dimension_semantics=("parallel",),   # megacore sharding on v7x
        ),
    )(state, action, w1s, w1a, b1, w2, b2, w3_row, b3)

    q = out.reshape(-1)
    if out_cols != B:
        q = q[:B]        # tiny B*4-byte copy only when the batch is ragged
    return q.reshape(B, 1)


def init_qnetwork_params(key, state_dim, action_dim, hidden_dim):
    """Deterministic init mimicking nn.Linear default (U[-1/sqrt(fan_in), 1/sqrt(fan_in)]).
    Weights stored as (in_features, out_features)."""
    dims = [(state_dim + action_dim, hidden_dim),
            (hidden_dim, hidden_dim),
            (hidden_dim, 1)]
    params = []
    for (fan_in, fan_out) in dims:
        key, kw, kb = jax.random.split(key, 3)
        bound = 1.0 / np.sqrt(fan_in)
        w = jax.random.uniform(kw, (fan_in, fan_out), jnp.float32, -bound, bound)
        b = jax.random.uniform(kb, (1, fan_out), jnp.float32, -bound, bound)
        params += [w, b]
    return tuple(params)


def qnetwork_reference(state, action, params):
    """Pure-JAX reference for correctness check."""
    w1, b1, w2, b2, w3, b3 = params
    x = jnp.concatenate([state, action], axis=-1)
    x = jnp.maximum(x @ w1 + b1, 0.0)
    x = jnp.maximum(x @ w2 + b2, 0.0)
    return x @ w3 + b3


if __name__ == "__main__":
    STATE_DIM, ACTION_DIM, HIDDEN_DIM = 16, 16, 32

    key = jax.random.PRNGKey(0)
    k_state, k_action, k_params = jax.random.split(key, 3)
    params = init_qnetwork_params(k_params, STATE_DIM, ACTION_DIM, HIDDEN_DIM)

    # Tolerance absorbs MXU precision-pass differences between the in-kernel
    # f32 matmuls and the XLA reference; genuine layout/weight bugs are O(1).
    RTOL = ATOL = 1e-2

    # Small single-block case (B=8, grid=1, full-extent blocks).
    B = 8
    state = jax.random.normal(k_state, (B, STATE_DIM), jnp.float32)
    action = jax.random.normal(k_action, (B, ACTION_DIM), jnp.float32)
    q = jax.block_until_ready(qnetwork_forward(state, action, params))
    q_ref = qnetwork_reference(state, action, params)
    np.testing.assert_allclose(np.asarray(q), np.asarray(q_ref), rtol=RTOL, atol=ATOL)
    assert q.shape == (B, 1) and q.dtype == jnp.float32

    # Multi-tile ragged case (grid=2, tm=384, partial final block — no padding).
    B2 = 600
    state2 = jax.random.normal(k_state, (B2, STATE_DIM), jnp.float32)
    action2 = jax.random.normal(k_action, (B2, ACTION_DIM), jnp.float32)
    q2 = jax.block_until_ready(qnetwork_forward(state2, action2, params))
    q2_ref = qnetwork_reference(state2, action2, params)
    np.testing.assert_allclose(np.asarray(q2), np.asarray(q2_ref), rtol=RTOL, atol=ATOL)
    assert q2.shape == (B2, 1)

    print("KERNEL_OK")
</pallas_src>

<mosaic_0001>
module attributes {stable_mosaic.version = 11 : i64} {
  func.func @qnetwork_kernel(%arg0: i32, %arg1: memref<8x16xf32, #tpu.memory_space<vmem>>, %arg2: memref<8x16xf32, #tpu.memory_space<vmem>>, %arg3: memref<16x32xf32, #tpu.memory_space<vmem>>, %arg4: memref<16x32xf32, #tpu.memory_space<vmem>>, %arg5: memref<1x32xf32, #tpu.memory_space<vmem>>, %arg6: memref<32x32xf32, #tpu.memory_space<vmem>>, %arg7: memref<1x32xf32, #tpu.memory_space<vmem>>, %arg8: memref<1x32xf32, #tpu.memory_space<vmem>>, %arg9: memref<1x1xf32, #tpu.memory_space<vmem>>, %arg10: memref<1x8xf32, #tpu.memory_space<vmem>>) attributes {dimension_semantics = [#tpu.dimension_semantics<parallel>], iteration_bounds = array<i64: 1>, scalar_prefetch = 0 : i64, scratch_operands = 0 : i64, tpu.core_type = #tpu.core_type<tc>, window_params = [{transform_indices = @transform_0, window_bounds = array<i64: 8, 16>}, {transform_indices = @transform_1, window_bounds = array<i64: 8, 16>}, {pipeline_mode = #tpu.pipeline_mode<synchronous>, transform_indices = @transform_2, window_bounds = array<i64: 16, 32>}, {pipeline_mode = #tpu.pipeline_mode<synchronous>, transform_indices = @transform_3, window_bounds = array<i64: 16, 32>}, {pipeline_mode = #tpu.pipeline_mode<synchronous>, transform_indices = @transform_4, window_bounds = array<i64: 1, 32>}, {pipeline_mode = #tpu.pipeline_mode<synchronous>, transform_indices = @transform_5, window_bounds = array<i64: 32, 32>}, {pipeline_mode = #tpu.pipeline_mode<synchronous>, transform_indices = @transform_6, window_bounds = array<i64: 1, 32>}, {pipeline_mode = #tpu.pipeline_mode<synchronous>, transform_indices = @transform_7, window_bounds = array<i64: 1, 32>}, {pipeline_mode = #tpu.pipeline_mode<synchronous>, transform_indices = @transform_8, window_bounds = array<i64: 1, 1>}, {transform_indices = @transform_9, window_bounds = array<i64: 1, 8>}]} {
    %c0 = arith.constant 0 : index
    %c0_0 = arith.constant 0 : index
    %0 = vector.load %arg1[%c0, %c0_0] : memref<8x16xf32, #tpu.memory_space<vmem>>, vector<8x16xf32>
    %c0_1 = arith.constant 0 : index
    %c0_2 = arith.constant 0 : index
    %1 = vector.load %arg3[%c0_1, %c0_2] : memref<16x32xf32, #tpu.memory_space<vmem>>, vector<16x32xf32>
    %cst = arith.constant dense<0.000000e+00> : vector<8x32xf32>
    %2 = tpu.matmul %0, %1, %cst {dimension_numbers = #tpu.dot_dimension_numbers<[1], [0], [0], [1], [0, 0, 1, 1], [], []>} : vector<8x16xf32>, vector<16x32xf32>, vector<8x32xf32> -> vector<8x32xf32>
    %c0_3 = arith.constant 0 : index
    %c0_4 = arith.constant 0 : index
    %3 = vector.load %arg2[%c0_3, %c0_4] : memref<8x16xf32, #tpu.memory_space<vmem>>, vector<8x16xf32>
    %c0_5 = arith.constant 0 : index
    %c0_6 = arith.constant 0 : index
    %4 = vector.load %arg4[%c0_5, %c0_6] : memref<16x32xf32, #tpu.memory_space<vmem>>, vector<16x32xf32>
    %cst_7 = arith.constant dense<0.000000e+00> : vector<8x32xf32>
    %5 = tpu.matmul %3, %4, %cst_7 {dimension_numbers = #tpu.dot_dimension_numbers<[1], [0], [0], [1], [0, 0, 1, 1], [], []>} : vector<8x16xf32>, vector<16x32xf32>, vector<8x32xf32> -> vector<8x32xf32>
    %6 = arith.addf %2, %5 : vector<8x32xf32>
    %c0_8 = arith.constant 0 : index
    %c0_9 = arith.constant 0 : index
    %7 = vector.load %arg5[%c0_8, %c0_9] : memref<1x32xf32, #tpu.memory_space<vmem>>, vector<1x32xf32>
    %8 = vector.broadcast %7 : vector<1x32xf32> to vector<8x32xf32>
    %9 = arith.addf %6, %8 : vector<8x32xf32>
    %cst_10 = arith.constant 0.000000e+00 : f32
    %10 = vector.broadcast %cst_10 : f32 to vector<8x32xf32>
    %11 = arith.maximumf %9, %10 : vector<8x32xf32>
    %c0_11 = arith.constant 0 : index
    %c0_12 = arith.constant 0 : index
    %12 = vector.load %arg6[%c0_11, %c0_12] : memref<32x32xf32, #tpu.memory_space<vmem>>, vector<32x32xf32>
    %cst_13 = arith.constant dense<0.000000e+00> : vector<8x32xf32>
    %13 = tpu.matmul %11, %12, %cst_13 {dimension_numbers = #tpu.dot_dimension_numbers<[1], [0], [0], [1], [0, 0, 1, 1], [], []>} : vector<8x32xf32>, vector<32x32xf32>, vector<8x32xf32> -> vector<8x32xf32>
    %c0_14 = arith.constant 0 : index
    %c0_15 = arith.constant 0 : index
    %14 = vector.load %arg7[%c0_14, %c0_15] : memref<1x32xf32, #tpu.memory_space<vmem>>, vector<1x32xf32>
    %15 = vector.broadcast %14 : vector<1x32xf32> to vector<8x32xf32>
    %16 = arith.addf %13, %15 : vector<8x32xf32>
    %cst_16 = arith.constant 0.000000e+00 : f32
    %17 = vector.broadcast %cst_16 : f32 to vector<8x32xf32>
    %18 = arith.maximumf %16, %17 : vector<8x32xf32>
    %c0_17 = arith.constant 0 : index
    %c0_18 = arith.constant 0 : index
    %19 = vector.load %arg8[%c0_17, %c0_18] : memref<1x32xf32, #tpu.memory_space<vmem>>, vector<1x32xf32>
    "tpu.trace_start"() <{level = 10 : i32, message = "oh,bh->ob"}> : () -> ()
    %cst_19 = arith.constant dense<0.000000e+00> : vector<1x8xf32>
    %20 = tpu.matmul %19, %18, %cst_19 {dimension_numbers = #tpu.dot_dimension_numbers<[1], [1], [0], [0], [0, 0, 1, 0], [], []>} : vector<1x32xf32>, vector<8x32xf32>, vector<1x8xf32> -> vector<1x8xf32>
    "tpu.trace_stop"() : () -> ()
    %c0_20 = arith.constant 0 : index
    %c0_21 = arith.constant 0 : index
    %21 = vector.load %arg9[%c0_20, %c0_21] : memref<1x1xf32, #tpu.memory_space<vmem>>, vector<1x1xf32>
    %22 = vector.broadcast %21 : vector<1x1xf32> to vector<1x8xf32>
    %23 = arith.addf %20, %22 : vector<1x8xf32>
    %c0_22 = arith.constant 0 : index
    %c0_23 = arith.constant 0 : index
    %24 = vector.load %arg10[%c0_22, %c0_23] : memref<1x8xf32, #tpu.memory_space<vmem>>, vector<1x8xf32>
    tpu.vector_store %arg10[%c0_22, %c0_23], %23 {strides = array<i32>} : memref<1x8xf32, #tpu.memory_space<vmem>>, vector<1x8xf32>,
    return
  }
  func.func @transform_0(%arg0: i32) -> (i32, i32) {
    %c0_i32 = arith.constant 0 : i32
    %c0_i32_0 = arith.constant 0 : i32
    return %arg0, %c0_i32 : i32, i32
  }
  func.func @transform_1(%arg0: i32) -> (i32, i32) {
    %c0_i32 = arith.constant 0 : i32
    %c0_i32_0 = arith.constant 0 : i32
    return %arg0, %c0_i32 : i32, i32
  }
  func.func @transform_2(%arg0: i32) -> (i32, i32) {
    %c0_i32 = arith.constant 0 : i32
    %c0_i32_0 = arith.constant 0 : i32
    %c0_i32_1 = arith.constant 0 : i32
    return %c0_i32, %c0_i32_0 : i32, i32
  }
  func.func @transform_3(%arg0: i32) -> (i32, i32) {
    %c0_i32 = arith.constant 0 : i32
    %c0_i32_0 = arith.constant 0 : i32
    %c0_i32_1 = arith.constant 0 : i32
    return %c0_i32, %c0_i32_0 : i32, i32
  }
  func.func @transform_4(%arg0: i32) -> (i32, i32) {
    %c0_i32 = arith.constant 0 : i32
    %c0_i32_0 = arith.constant 0 : i32
    %c0_i32_1 = arith.constant 0 : i32
    return %c0_i32, %c0_i32_0 : i32, i32
  }
  func.func @transform_5(%arg0: i32) -> (i32, i32) {
    %c0_i32 = arith.constant 0 : i32
    %c0_i32_0 = arith.constant 0 : i32
    %c0_i32_1 = arith.constant 0 : i32
    return %c0_i32, %c0_i32_0 : i32, i32
  }
  func.func @transform_6(%arg0: i32) -> (i32, i32) {
    %c0_i32 = arith.constant 0 : i32
    %c0_i32_0 = arith.constant 0 : i32
    %c0_i32_1 = arith.constant 0 : i32
    return %c0_i32, %c0_i32_0 : i32, i32
  }
  func.func @transform_7(%arg0: i32) -> (i32, i32) {
    %c0_i32 = arith.constant 0 : i32
    %c0_i32_0 = arith.constant 0 : i32
    %c0_i32_1 = arith.constant 0 : i32
    return %c0_i32, %c0_i32_0 : i32, i32
  }
  func.func @transform_8(%arg0: i32) -> (i32, i32) {
    %c0_i32 = arith.constant 0 : i32
    %c0_i32_0 = arith.constant 0 : i32
    %c0_i32_1 = arith.constant 0 : i32
    return %c0_i32, %c0_i32_0 : i32, i32
  }
  func.func @transform_9(%arg0: i32) -> (i32, i32) {
    %c0_i32 = arith.constant 0 : i32
    %c0_i32_0 = arith.constant 0 : i32
    return %c0_i32, %arg0 : i32, i32
  }
}

</mosaic_0001>

<bundles_post_ra>
// kernel: tpu_custom_call.1
= control target key start
LH: loop header
LB: loop body
LE: loop exit
PB: predicated region body
PF: predicated region fallthrough
CT: control target
= control target key end

     0   :  { %s827_s0 = inlined_call_operand.hbm [shape: f32[8,16], index: 0, kind: input, shape index: {}]   ;;  %s828_s1 = inlined_call_operand.hbm [shape: f32[8,16], index: 1, kind: input, shape index: {}]   ;;  %s829_s2 = inlined_call_operand.hbm [shape: f32[16,32], index: 2, kind: input, shape index: {}]   ;;  %s830_s3 = inlined_call_operand.hbm [shape: f32[16,32], index: 3, kind: input, shape index: {}]   ;;  %s831_s4 = inlined_call_operand.vmem [shape: f32[1,32], index: 4, kind: input, shape index: {}]   ;;  %s832_s5 = inlined_call_operand.hbm [shape: f32[32,32], index: 5, kind: input, shape index: {}]   ;;  %s833_s6 = inlined_call_operand.vmem [shape: f32[1,32], index: 6, kind: input, shape index: {}]   ;;  %s834_s7 = inlined_call_operand.vmem [shape: f32[1,32], index: 7, kind: input, shape index: {}]   ;;  %s835_s8 = inlined_call_operand.<no memory space> [shape: f32[1,1], index: 8, kind: input, shape index: {}]   ;;  %s836_s9 = inlined_call_operand.hbm [shape: f32[1,8], index: 9, kind: output, shape index: {}]  }
   0x1   :  { %v14_v0 = vstv %s835_s8 }
   0x2   :  { %15 = vst [vmem:[#allocation2] sm:$0x1] %v14_v0 }
   0x3   :  { %16 = vsyncpa [#allocation4], 0 }
   0x4   :  { %17 = vsyncpa [#allocation7], 0 }
   0x5   :  { %18 = vsyncpa [#allocation10], 0 }
   0x6   :  { %19 = vsyncpa [#allocation5], 0  ;;  %s668_s11 = smov [#allocation6]   ;;  %s528_s15 = scalar_lea.hbm %s828_s1, 128 }
   0x7   :  { %s36_s12 = sshll.u32 %s668_s11, 4  ;;  %p529_p0 = scmp.ne.s32.totalorder %s828_s1, %s528_s15  ;;  %s37_s12 = int_to_ptr.vmem [resolvable:$true] %s36_s12 }
   0x8   :  { %p532_p1 = scmp.lt.u32.totalorder %s528_s15, %s828_s1 }
   0xa   :  { %p534_p2 = pnand %p532_p1, %p529_p0 }
   0xc   :  { %537 = shalt.err (!%p534_p2)
}
   0xd   :  { %s538_s8 = scalar_lea.vmem %s37_s12, 128  ;;  %p543_p4 = scmp.lt.s32.totalorder %s37_s12, %s37_s12 }
   0xe   :  { %p539_p3 = scmp.ne.s32.totalorder %s37_s12, %s538_s8  ;;  %p544_p5 = scmp.lt.s32.totalorder %s538_s8, %s538_s8 }
  0x10   :  { %p545_p6 = por %p544_p5, %p543_p4 }
  0x12   :  { %p546_p7 = pnand %p545_p6, %p539_p3 }
  0x14   :  { %549 = shalt.err (!%p546_p7)
}
  0x15   :  { %39 = dma.hbm_to_vmem [thread:$0]  %s828_s1, 128, %s37_s12, [#allocation7]  }
  0x16   :  { %s669_s22 = smov [#allocation9]   ;;  %s670_s24 = smov [#allocation3]  }
  0x17   :  { %s57_s23 = sshll.u32 %s669_s22, 4  ;;  %s26_s25 = sshll.u32 %s670_s24, 4  ;;  %s58_s23 = int_to_ptr.vmem [resolvable:$true] %s57_s23  ;;  %s27_s25 = int_to_ptr.vmem [resolvable:$true] %s26_s25 }
  0x18   :  { %s550_s28 = scalar_lea.hbm %s830_s3, 256 }
  0x19   :  { %p551_p8 = scmp.ne.s32.totalorder %s830_s3, %s550_s28  ;;  %p554_p9 = scmp.lt.u32.totalorder %s550_s28, %s830_s3 }
  0x1b   :  { %p556_p10 = pnand %p554_p9, %p551_p8 }
  0x1d   :  { %559 = shalt.err (!%p556_p10)
}
  0x1e   :  { %s560_s1 = scalar_lea.vmem %s58_s23, 256  ;;  %p565_p12 = scmp.lt.s32.totalorder %s58_s23, %s58_s23 }
  0x1f   :  { %p561_p11 = scmp.ne.s32.totalorder %s58_s23, %s560_s1  ;;  %p566_p13 = scmp.lt.s32.totalorder %s560_s1, %s560_s1 }
  0x21   :  { %p567_p0 = por %p566_p13, %p565_p12 }
  0x23   :  { %p568_p1 = pnand %p567_p0, %p561_p11 }
  0x25   :  { %571 = shalt.err (!%p568_p1)
}
  0x26   :  { %s671_s12 = smov 128   ;;  %s672_s13 = smov 8  }
  0x27   :  { %63 = dma.hbm_to_vmem [thread:$0]  %s830_s3, 256, %s58_s23, [#allocation10], %s671_s12, %s671_s12, %s672_s13  }
  0x28   :  { %s572_s18 = scalar_lea.hbm %s827_s0, 128 }
  0x29   :  { %p573_p2 = scmp.ne.s32.totalorder %s827_s0, %s572_s18  ;;  %p576_p3 = scmp.lt.u32.totalorder %s572_s18, %s827_s0 }
  0x2b   :  { %p578_p4 = pnand %p576_p3, %p573_p2 }
  0x2d   :  { %581 = shalt.err (!%p578_p4)
}
  0x2e   :  { %s582_s22 = scalar_lea.vmem %s27_s25, 128  ;;  %p587_p6 = scmp.lt.s32.totalorder %s27_s25, %s27_s25 }
  0x2f   :  { %p583_p5 = scmp.ne.s32.totalorder %s27_s25, %s582_s22  ;;  %p588_p7 = scmp.lt.s32.totalorder %s582_s22, %s582_s22 }
  0x31   :  { %p589_p8 = por %p588_p7, %p587_p6 }
  0x33   :  { %p590_p9 = pnand %p589_p8, %p583_p5 }
  0x35   :  { %593 = shalt.err (!%p590_p9)
}
  0x36   :  { %29 = dma.hbm_to_vmem [thread:$0]  %s827_s0, 128, %s27_s25, [#allocation4]  }
  0x37   :  { %s673_s24 = smov [#allocation8]   ;;  %s674_s27 = smov [#allocation11]  }
  0x38   :  { %s45_s26 = sshll.u32 %s673_s24, 4  ;;  %s71_s28 = sshll.u32 %s674_s27, 4  ;;  %s46_s26 = int_to_ptr.vmem [resolvable:$true] %s45_s26  ;;  %s72_s28 = int_to_ptr.vmem [resolvable:$true] %s71_s28 }
  0x39   :  { %s594_s10 = scalar_lea.hbm %s829_s2, 256 }
  0x3a   :  { %p595_p10 = scmp.ne.s32.totalorder %s829_s2, %s594_s10  ;;  %p598_p11 = scmp.lt.u32.totalorder %s594_s10, %s829_s2 }
  0x3c   :  { %p600_p12 = pnand %p598_p11, %p595_p10 }
  0x3e   :  { %603 = shalt.err (!%p600_p12)
}
  0x3f   :  { %s604_s0 = scalar_lea.vmem %s46_s26, 256  ;;  %p609_p0 = scmp.lt.s32.totalorder %s46_s26, %s46_s26 }
  0x40   :  { %p605_p13 = scmp.ne.s32.totalorder %s46_s26, %s604_s0  ;;  %p610_p1 = scmp.lt.s32.totalorder %s604_s0, %s604_s0 }
  0x42   :  { %p611_p2 = por %p610_p1, %p609_p0 }
  0x44   :  { %p612_p3 = pnand %p611_p2, %p605_p13 }
  0x46   :  { %615 = shalt.err (!%p612_p3)
}
  0x47   :  { %51 = dma.hbm_to_vmem [thread:$0]  %s829_s2, 256, %s46_s26, [#allocation7], %s671_s12, %s671_s12, %s672_s13  }
  0x48   :  { %s616_s19 = scalar_lea.hbm %s832_s5, 512 }
  0x49   :  { %p617_p4 = scmp.ne.s32.totalorder %s832_s5, %s616_s19  ;;  %p620_p5 = scmp.lt.u32.totalorder %s616_s19, %s832_s5 }
  0x4b   :  { %p622_p6 = pnand %p620_p5, %p617_p4 }
  0x4d   :  { %625 = shalt.err (!%p622_p6)
}
  0x4e   :  { %s626_s3 = scalar_lea.vmem %s72_s28, 512  ;;  %p631_p8 = scmp.lt.s32.totalorder %s72_s28, %s72_s28 }
  0x4f   :  { %p627_p7 = scmp.ne.s32.totalorder %s72_s28, %s626_s3  ;;  %p632_p9 = scmp.lt.s32.totalorder %s626_s3, %s626_s3 }
  0x51   :  { %p633_p10 = por %p632_p9, %p631_p8 }
  0x53   :  { %p634_p11 = pnand %p633_p10, %p627_p7 }
  0x55   :  { %637 = shalt.err (!%p634_p11)
}
  0x56   :  { %77 = dma.hbm_to_vmem [thread:$0]  %s832_s5, 512, %s72_s28, [#allocation10], %s671_s12, %s671_s12, %s672_s13  }
  0x57   :  { %660 = dma.done.wait [#allocation4], 128  }
  0x58   :  { %661 = vsyncadd [#allocation4], 4294967168 }
  0x59   :  { %662 = dma.done.wait [#allocation7], 384  }
  0x5a   :  { %663 = vsyncadd [#allocation7], 4294966912 }
  0x5b   :  { %664 = dma.done.wait [#allocation10], 768  }
  0x5c   :  { %665 = vsyncadd [#allocation10], 4294966528  ;;  %v675_v1 = vmov 0.0|0.0   ;;  %vm676_vm0 = vmmov 0   ;;  %v677_v2 = vmov 0.0   ;;  %v103_v3 = vld [vmem:[#allocation9] sm:$0xff]  ;;  %v354_v33 = vlaneseq }
  0x5d   :  { %503 = vmatprep.subr.bf16.mxu0 %v675_v1  ;;  %506 = vmatprep.subr.bf16.mxu1 %v675_v1  ;;  %v104_v4 = vld [vmem:[#allocation9 + $0x8] sm:$0xff]  ;;  %v100_v5 = vld [vmem:[#allocation8] sm:$0xff]  ;;  %v101_v7 = vld [vmem:[#allocation8 + $0x8] sm:$0xff]  ;;  %vm105_vm1 = vcmask 130048   ;;  %vm272_vm2 = vcmask 261120   ;;  %v678_v26 = vmov 0  }
  0x5e   :  { %477 = vmatprep.mubr.msk.f32.mxu0 %vm676_vm0, %v677_v2  ;;  %484 = vmatprep.mubr.msk.f32.mxu1 %vm676_vm0, %v677_v2  ;;  %v504_v6 = vpack.c.bf16 %v104_v4, %v103_v3  ;;  %v507_v8 = vpack.c.bf16 %v101_v7, %v100_v5  ;;  %v102_v9 = vld [vmem:[#allocation6] sm:$0xff]  ;;  %v99_v10 = vld [vmem:[#allocation3] sm:$0xff]  ;;  %v261_v11 = vld [vmem:[#allocation11] sm:$0xff]  ;;  %v355_v34 = vshrl.u32 %v354_v33, 7  ;;  %s679_s27 = smov [#allocation12]   ;;  %vm434_vm3 = vcmask 57344  }
  0x5f   :  { %v262_v12 = vld [vmem:[#allocation11 + $0x8] sm:$0xff]  ;;  %v263_v14 = vld [vmem:[#allocation11 + $0x10] sm:$0xff]  ;;  %v264_v15 = vld [vmem:[#allocation11 + $0x18] sm:$0xff]  ;;  %527 = vset.pattern.permute.xlu0 %v678_v26  ;;  %s442_s28 = sshll.u32 %s679_s27, 4  ;;  %s443_s28 = int_to_ptr.vmem [resolvable:$true] %s442_s28 }
  0x60   :  { %505 = vmatpush3.bf16.msra.mxu0 %v504_v6  ;;  %508 = vmatpush3.bf16.msra.mxu1 %v507_v8  ;;  %v510_v13 = vpack.c.bf16 %v262_v12, %v261_v11  ;;  %v513_v16 = vpack.c.bf16 %v264_v15, %v263_v14  ;;  %v455_v19 = vld [vmem:[%s831_s4] ss:$0 sm:$0xff]  ;;  %v356_v35 = vsub.s32 0, %v355_v34  ;;  %s642_s29 = scalar_lea.vmem %s443_s28, 32  ;;  %p643_p13 = scmp.lt.s32.totalorder %s443_s28, %s443_s28 }
  0x61   :  { %509 = vmatprep.subr.bf16.mxu0 %v675_v1  ;;  %498 = vmatprep.subr.mxu1 %v677_v2  ;;  %v348_v25 = vld [vmem:[#allocation2] sm:$0x1] }
  0x62   :  { %351 = vperm.xlu0 %527, %v348_v25   ;;  %v456_v27 = vld [vmem:[%s833_s6] ss:$0 sm:$0xff]  ;;  %s638_s6 = scalar_lea.vmem %s443_s28, 16 }
  0x63   :  { %478 = vmatmul.mubr.msk.f32.vlgmr.msra.gmra.mrb[0].mxu0 %vm105_vm1, %v102_v9  ;;  %485 = vmatmul.mubr.msk.f32.vlgmr.msra.gmra.mrb[0].mxu1 %vm105_vm1, %v99_v10  ;;  %v347_v32 = vld [vmem:[%s834_s7] sm:$0x1]  ;;  %p639_p12 = scmp.ne.s32.totalorder %s443_s28, %s638_s6  ;;  %p644_p0 = scmp.lt.s32.totalorder %s642_s29, %s638_s6 }
  0x64   :  { %495 = vmatprep.mubr.msk.f32.mxu0 %vm676_vm0, %v677_v2  ;;  %500 = vmatprep.mubr.msk.f32.mxu1 %vm676_vm0, %v677_v2 }
  0x65   :  { %511 = vmatpush3.bf16.msra.mxu0 %v510_v13  ;;  %p645_p1 = por %p644_p0, %p643_p13 }
  0x66   :  { %512 = vmatprep.subr.bf16.mxu0 %v675_v1 }
  0x67   :  { %p646_p2 = pnand %p645_p1, %p639_p12 }
  0x69   :  { %514 = vmatpush3.bf16.msra.mxu0 %v513_v16 }
  0xe1   :  { %v352_v36 = vpop.permute.xlu0 %351 }
  0xe2   :  { %v357_v37 = vrot.slane %v352_v36, %v356_v35 }
 0x136   :  { %v175_v17 = vpop.f32.mrb[0].mxu0  ;;  %v248_v18 = vpop.f32.mrb[0].mxu1 }
 0x137   :  { %v479_v20 = vpop.f32.mrb[1].mxu0  ;;  %v249_v21 = vadd.f32 %v248_v18, %v175_v17  ;;  %v486_v22 = vpop.f32.mrb[1].mxu1 }
 0x139   :  { %v259_v23 = vadd.f32 %v455_v19, %v249_v21 }
 0x13b   :  { %v260_v24 = vmax.f32 %v259_v23, 0.0 }
 0x13d   :  { %496 = vmatmul.mubr.msk.f32.vlgmr.msra.gmra.mrb[2].mxu0 %vm272_vm2, %v260_v24 }
 0x210   :  { %v342_v28 = vpop.f32.mrb[2].mxu0 }
 0x211   :  { %v343_v29 = vadd.f32 %v456_v27, %v342_v28  ;;  %v497_v30 = vpop.f32.mrb[3].mxu0 }
 0x213   :  { %v346_v31 = vmax.f32 %v343_v29, 0.0 }
 0x215   :  { %499 = vmatpush3.xpose.msk.msra.mxu1 %vm272_vm2, %v346_v31 }
 0x218   :  { %501 = vmatmul.mubr.msk.f32.vlgmr.msra.gmra.mrb[2].mxu1 %vm272_vm2, %v347_v32 }
 0x2eb   :  { %v430_v38 = vpop.f32.mrb[2].mxu1 }
 0x2ec   :  { %v431_v39 = vadd.f32 %v430_v38, %v357_v37  ;;  %v502_v40 = vpop.f32.mrb[3].mxu1 }
 0x2ee   :  { %435 = vst.msk [vmem:[#allocation12] sm:$0x1] %vm434_vm3, %v431_v39 }
 0x2ef   :  { %649 = shalt.err (!%p646_p2)
}
 0x2f0   :  { %s650_s10 = scalar_lea.hbm %s836_s9, 16 }
 0x2f1   :  { %p651_p3 = scmp.ne.s32.totalorder %s836_s9, %s650_s10  ;;  %p654_p4 = scmp.lt.u32.totalorder %s650_s10, %s836_s9 }
 0x2f3   :  { %p656_p5 = pnand %p654_p4, %p651_p3 }
 0x2f5   :  { %659 = shalt.err (!%p656_p5)
}
 0x2f6   :  { %445 = dma.vmem_to_hbm [thread:$0]  %s443_s28, 16, %s836_s9, [#allocation5]  }
 0x2f7   :  { %666 = dma.done.wait [#allocation5], 16  }
 0x2f8   :  { %667 = vsyncadd [#allocation5], 4294967280 }
 0x2f9   :  { %449 = vsyncpa [#allocation4], 1 }
 0x2fa   :  { %450 = vsyncpa [#allocation7], 1 }
 0x2fb   :  { %451 = vsyncpa [#allocation10], 1 }
 0x2fc   :  { %452 = vsyncpa [#allocation5], 1 }

</bundles_post_ra>
